<compile_context>
chip_gen: v5e
topology: v5e:2x2
jax: 0.10.0
libtpu: 0.0.40
codegen_flags: <defaults>
</compile_context>

<pallas_src>
import jax
import jax.numpy as jnp
from jax.experimental import pallas as pl
from jax.experimental.pallas import tpu as pltpu


def _sobel_kernel(x_ref, halo_ref, o_ref):
    # x_ref    : (NB, TH, W)     image rows of this tile (native input dtype)
    # halo_ref : (NB, 1, 2, W)   [row above tile, row below tile], replicate-clamped
    # o_ref    : (NB, 2, TH, W)  channel 0 = Gx, channel 1 = Gy (float32)
    x = x_ref[...].astype(jnp.float32)       # in-kernel upcast (no-op for f32)
    halo = halo_ref[...].astype(jnp.float32)
    top = halo[:, 0, 0:1, :]                 # (NB, 1, W)
    bot = halo[:, 0, 1:2, :]                 # (NB, 1, W)
    th = o_ref.shape[2]

    # Tile extended by one halo row above and below: rows 0 .. TH+1.
    xe = jnp.concatenate([top, x, bot], axis=1)                    # (NB, TH+2, W)

    # Replicate-padded column (lane) shifts — done ONCE thanks to the separable
    # form of the Sobel kernel.
    xl = jnp.concatenate([xe[:, :, :1], xe[:, :, :-1]], axis=2)    # x[.., j-1]
    xr = jnp.concatenate([xe[:, :, 1:], xe[:, :, -1:]], axis=2)    # x[.., j+1]

    h1 = xl - xr                      # horizontal factor of Gx
    h2 = xl + 2.0 * xe + xr           # horizontal factor of Gy

    # Vertical combination uses only cheap row (sublane) shifts.
    gx = h1[:, 0:th] + 2.0 * h1[:, 1:th + 1] + h1[:, 2:th + 2]
    gy = h2[:, 0:th] - h2[:, 2:th + 2]

    # Two full-width, lane-dense stores (one per output channel).
    o_ref[:, 0, :, :] = gx
    o_ref[:, 1, :, :] = gy


_DEFAULT_VMEM_CAPACITY = 64 * 1024 * 1024   # conservative fallback (= v7x per-core VMEM)
_VMEM_LIMIT_FRACTION = 0.85                 # scoped-VMEM limit handed to Mosaic
_VMEM_BUDGET_FRACTION = 0.65                # fraction the tile picker may plan against
_BYTES_PER_INPUT_ELEM = 72                  # per-step footprint per input element:
                                            #   2x4B input + 2x8B output (double-buffered)
                                            #   + ~10x4B f32 temporaries / relayout copies


def _vmem_capacity_bytes() -> int:
    try:
        cap = int(pltpu.get_tpu_info().vmem_capacity_bytes)
        if cap > 0:
            return cap
    except Exception:
        pass
    return _DEFAULT_VMEM_CAPACITY


def _pick_row_tile(H: int, W: int, max_in_elems: int, align: int) -> int:
    """Largest row tile TH (divisor of H, multiple of `align`) with TH*W <= budget."""
    if H * W <= max_in_elems:
        return H
    cands = [d for d in range(align, H + 1, align) if H % d == 0]
    if not cands:
        return H
    fitting = [d for d in cands if d * W <= max_in_elems]
    return max(fitting) if fitting else min(cands)


def _pick_batch_tile(N: int, img_elems: int, max_in_elems: int) -> int:
    """Fold several (small) images into one grid step to amortize step overhead."""
    cap = max(1, max_in_elems // max(1, img_elems))
    for d in range(min(N, cap), 0, -1):
        if N % d == 0:
            return d
    return 1


def sobel(img: jax.Array) -> jax.Array:
    """img: (N, 1, H, W) -> (N, 2, H, W) float32 (Gx, Gy), replicate 'same' padding."""
    assert img.ndim == 4 and img.shape[1] == 1, "expected NCHW with C=1"
    N, _, H, W = img.shape

    x = img.reshape(N, H, W)
    if x.dtype == jnp.float32:
        row_align = 8
    elif x.dtype == jnp.bfloat16:
        row_align = 16
    else:
        x = x.astype(jnp.float32)   # unsupported in-kernel dtype -> wrapper cast
        row_align = 8

    # Edge-pad so row tiles satisfy the (8,128)/(16,128) rule and the last dim is
    # lane-dense.  Edge padding commutes with the replicate-padded convolution,
    # so slicing the padded output back to (H, W) is exact.
    Hp = ((H + row_align - 1) // row_align) * row_align
    Wp = ((W + 127) // 128) * 128
    if Hp != H or Wp != W:
        x = jnp.pad(x, ((0, 0), (0, Hp - H), (0, Wp - W)), mode="edge")

    # Generation-aware tile budget (total per-step VMEM footprint, not just input).
    vmem_cap = _vmem_capacity_bytes()
    max_in_elems = max(
        row_align * Wp,
        int(vmem_cap * _VMEM_BUDGET_FRACTION) // _BYTES_PER_INPUT_ELEM,
    )

    TH = _pick_row_tile(Hp, Wp, max_in_elems, row_align)
    NB = _pick_batch_tile(N, Hp * Wp, max_in_elems) if TH == Hp else 1
    n_row_tiles = Hp // TH

    # Per-row-tile halo rows (replicate-clamped at the image border).  This is a
    # tiny gather (2 rows per TH rows), NOT a full-image pad pass.
    starts = jnp.arange(n_row_tiles, dtype=jnp.int32) * TH
    top_idx = jnp.maximum(starts - 1, 0)
    bot_idx = jnp.minimum(starts + TH, Hp - 1)
    row_idx = jnp.stack([top_idx, bot_idx], axis=1)        # (n_row_tiles, 2)
    halos = x[:, row_idx, :]                               # (N, n_row_tiles, 2, Wp)

    in_bytes = int(x.size) * x.dtype.itemsize + int(halos.size) * halos.dtype.itemsize
    out_bytes = N * 2 * Hp * Wp * 4
    cost = pl.CostEstimate(
        flops=int(10 * N * Hp * Wp),
        transcendentals=0,
        bytes_accessed=int(in_bytes + out_bytes),
    )

    out = pl.pallas_call(
        _sobel_kernel,
        out_shape=jax.ShapeDtypeStruct((N, 2, Hp, Wp), jnp.float32),
        grid_spec=pltpu.PrefetchScalarGridSpec(
            num_scalar_prefetch=0,
            grid=(N // NB, n_row_tiles),
            in_specs=[
                pl.BlockSpec((NB, TH, Wp), lambda b, i: (b, i, 0)),
                pl.BlockSpec((NB, 1, 2, Wp), lambda b, i: (b, i, 0, 0)),
            ],
            out_specs=pl.BlockSpec((NB, 2, TH, Wp), lambda b, i: (b, 0, i, 0)),
        ),
        compiler_params=pltpu.CompilerParams(
            dimension_semantics=("parallel", "parallel"),
            vmem_limit_bytes=int(vmem_cap * _VMEM_LIMIT_FRACTION),
        ),
        cost_estimate=cost,
    )(x, halos)

    if Hp != H or Wp != W:
        out = out[:, :, :H, :W]
    return out


def _reference_sobel(img: jax.Array) -> jax.Array:
    """Pure-JAX reference (mirrors nn.Conv2d(1,2,3,'same','replicate', bias=False))."""
    gx = jnp.array([[1.0, 0.0, -1.0], [2.0, 0.0, -2.0], [1.0, 0.0, -1.0]], jnp.float32)
    gy = jnp.array([[1.0, 2.0, 1.0], [0.0, 0.0, 0.0], [-1.0, -2.0, -1.0]], jnp.float32)
    w = jnp.stack([gx, gy], axis=0)[:, None, :, :]  # (2, 1, 3, 3)
    xp = jnp.pad(img.astype(jnp.float32), ((0, 0), (0, 0), (1, 1), (1, 1)), mode="edge")
    return jax.lax.conv_general_dilated(
        xp, w, window_strides=(1, 1), padding="VALID",
        dimension_numbers=("NCHW", "OIHW", "NCHW"),
    )


if __name__ == "__main__":
    key = jax.random.PRNGKey(0)
    N, C, H, W = 2, 1, 16, 16  # Sobel's Conv2d has in_channels=1
    img = jax.random.normal(key, (N, C, H, W), dtype=jnp.float32)

    out = sobel(img)
    out = jax.block_until_ready(out)

    ref = _reference_sobel(img)
    assert out.shape == (N, 2, H, W)
    assert jnp.allclose(out, ref, atol=1e-5, rtol=1e-5)

    print("KERNEL_OK")
</pallas_src>

<mosaic_0001>
module attributes {stable_mosaic.version = 11 : i64} {
  func.func @_sobel_kernel(%arg0: i32, %arg1: i32, %arg2: memref<2x16x128xf32, #tpu.memory_space<vmem>>, %arg3: memref<2x1x2x128xf32, #tpu.memory_space<vmem>>, %arg4: memref<2x2x16x128xf32, #tpu.memory_space<vmem>>) attributes {dimension_semantics = [#tpu.dimension_semantics<parallel>, #tpu.dimension_semantics<parallel>], iteration_bounds = array<i64: 1, 1>, scalar_prefetch = 0 : i64, scratch_operands = 0 : i64, tpu.core_type = #tpu.core_type<tc>, window_params = [{transform_indices = @transform_0, window_bounds = array<i64: 2, 16, 128>}, {transform_indices = @transform_1, window_bounds = array<i64: 2, 1, 2, 128>}, {transform_indices = @transform_2, window_bounds = array<i64: 2, 2, 16, 128>}]} {
    %c0 = arith.constant 0 : index
    %c0_0 = arith.constant 0 : index
    %c0_1 = arith.constant 0 : index
    %0 = vector.load %arg2[%c0, %c0_0, %c0_1] : memref<2x16x128xf32, #tpu.memory_space<vmem>>, vector<2x16x128xf32>
    %c0_2 = arith.constant 0 : index
    %c0_3 = arith.constant 0 : index
    %c0_4 = arith.constant 0 : index
    %c0_5 = arith.constant 0 : index
    %1 = vector.load %arg3[%c0_2, %c0_3, %c0_4, %c0_5] : memref<2x1x2x128xf32, #tpu.memory_space<vmem>>, vector<2x1x2x128xf32>
    %2 = vector.extract_strided_slice %1 {offsets = [0, 0, 0, 0], sizes = [2, 1, 1, 128], strides = [1, 1, 1, 1]} : vector<2x1x2x128xf32> to vector<2x1x1x128xf32>
    %3 = vector.shape_cast %2 : vector<2x1x1x128xf32> to vector<2x1x128xf32>
    %4 = vector.extract_strided_slice %1 {offsets = [0, 0, 1, 0], sizes = [2, 1, 1, 128], strides = [1, 1, 1, 1]} : vector<2x1x2x128xf32> to vector<2x1x1x128xf32>
    %5 = vector.shape_cast %4 : vector<2x1x1x128xf32> to vector<2x1x128xf32>
    %6 = tpu.concatenate %3, %0, %5 in 1 : vector<2x1x128xf32>, vector<2x16x128xf32>, vector<2x1x128xf32> -> vector<2x18x128xf32>
    %7 = vector.extract_strided_slice %6 {offsets = [0, 0, 0], sizes = [2, 18, 1], strides = [1, 1, 1]} : vector<2x18x128xf32> to vector<2x18x1xf32>
    %8 = vector.extract_strided_slice %6 {offsets = [0, 0, 0], sizes = [2, 18, 127], strides = [1, 1, 1]} : vector<2x18x128xf32> to vector<2x18x127xf32>
    %9 = tpu.concatenate %7, %8 in 2 : vector<2x18x1xf32>, vector<2x18x127xf32> -> vector<2x18x128xf32>
    %10 = vector.extract_strided_slice %6 {offsets = [0, 0, 1], sizes = [2, 18, 127], strides = [1, 1, 1]} : vector<2x18x128xf32> to vector<2x18x127xf32>
    %11 = vector.extract_strided_slice %6 {offsets = [0, 0, 127], sizes = [2, 18, 1], strides = [1, 1, 1]} : vector<2x18x128xf32> to vector<2x18x1xf32>
    %12 = tpu.concatenate %10, %11 in 2 : vector<2x18x127xf32>, vector<2x18x1xf32> -> vector<2x18x128xf32>
    %13 = arith.subf %9, %12 : vector<2x18x128xf32>
    %cst = arith.constant 2.000000e+00 : f32
    %14 = vector.broadcast %cst : f32 to vector<2x18x128xf32>
    %15 = arith.mulf %14, %6 : vector<2x18x128xf32>
    %16 = arith.addf %9, %15 : vector<2x18x128xf32>
    %17 = arith.addf %16, %12 : vector<2x18x128xf32>
    %18 = vector.extract_strided_slice %13 {offsets = [0, 0, 0], sizes = [2, 16, 128], strides = [1, 1, 1]} : vector<2x18x128xf32> to vector<2x16x128xf32>
    %19 = vector.extract_strided_slice %13 {offsets = [0, 1, 0], sizes = [2, 16, 128], strides = [1, 1, 1]} : vector<2x18x128xf32> to vector<2x16x128xf32>
    %cst_6 = arith.constant 2.000000e+00 : f32
    %20 = vector.broadcast %cst_6 : f32 to vector<2x16x128xf32>
    %21 = arith.mulf %20, %19 : vector<2x16x128xf32>
    %22 = arith.addf %18, %21 : vector<2x16x128xf32>
    %23 = vector.extract_strided_slice %13 {offsets = [0, 2, 0], sizes = [2, 16, 128], strides = [1, 1, 1]} : vector<2x18x128xf32> to vector<2x16x128xf32>
    %24 = arith.addf %22, %23 : vector<2x16x128xf32>
    %25 = vector.extract_strided_slice %17 {offsets = [0, 0, 0], sizes = [2, 16, 128], strides = [1, 1, 1]} : vector<2x18x128xf32> to vector<2x16x128xf32>
    %26 = vector.extract_strided_slice %17 {offsets = [0, 2, 0], sizes = [2, 16, 128], strides = [1, 1, 1]} : vector<2x18x128xf32> to vector<2x16x128xf32>
    %27 = arith.subf %25, %26 : vector<2x16x128xf32>
    %c0_7 = arith.constant 0 : index
    %c0_8 = arith.constant 0 : index
    %c0_9 = arith.constant 0 : index
    %c0_10 = arith.constant 0 : index
    %28 = vector.load %arg4[%c0_7, %c0_8, %c0_9, %c0_10] : memref<2x2x16x128xf32, #tpu.memory_space<vmem>>, vector<2x1x16x128xf32>
    %29 = vector.shape_cast %28 : vector<2x1x16x128xf32> to vector<2x16x128xf32>
    %30 = vector.shape_cast %24 : vector<2x16x128xf32> to vector<2x1x16x128xf32>
    tpu.vector_store %arg4[%c0_7, %c0_8, %c0_9, %c0_10], %30 {strides = array<i32>} : memref<2x2x16x128xf32, #tpu.memory_space<vmem>>, vector<2x1x16x128xf32>,
    %c0_11 = arith.constant 0 : index
    %c1 = arith.constant 1 : index
    %c0_12 = arith.constant 0 : index
    %c0_13 = arith.constant 0 : index
    %31 = vector.load %arg4[%c0_11, %c1, %c0_12, %c0_13] : memref<2x2x16x128xf32, #tpu.memory_space<vmem>>, vector<2x1x16x128xf32>
    %32 = vector.shape_cast %31 : vector<2x1x16x128xf32> to vector<2x16x128xf32>
    %33 = vector.shape_cast %27 : vector<2x16x128xf32> to vector<2x1x16x128xf32>
    tpu.vector_store %arg4[%c0_11, %c1, %c0_12, %c0_13], %33 {strides = array<i32>} : memref<2x2x16x128xf32, #tpu.memory_space<vmem>>, vector<2x1x16x128xf32>,
    return
  }
  func.func @transform_0(%arg0: i32, %arg1: i32) -> (i32, i32, i32) {
    %c0_i32 = arith.constant 0 : i32
    %c0_i32_0 = arith.constant 0 : i32
    return %arg0, %arg1, %c0_i32 : i32, i32, i32
  }
  func.func @transform_1(%arg0: i32, %arg1: i32) -> (i32, i32, i32, i32) {
    %c0_i32 = arith.constant 0 : i32
    %c0_i32_0 = arith.constant 0 : i32
    %c0_i32_1 = arith.constant 0 : i32
    return %arg0, %arg1, %c0_i32, %c0_i32_0 : i32, i32, i32, i32
  }
  func.func @transform_2(%arg0: i32, %arg1: i32) -> (i32, i32, i32, i32) {
    %c0_i32 = arith.constant 0 : i32
    %c0_i32_0 = arith.constant 0 : i32
    %c0_i32_1 = arith.constant 0 : i32
    return %arg0, %c0_i32, %arg1, %c0_i32_0 : i32, i32, i32, i32
  }
}

</mosaic_0001>

<bundles_post_ra>
// kernel: tpu_custom_call.1
= control target key start
LH: loop header
LB: loop body
LE: loop exit
PB: predicated region body
PF: predicated region fallthrough
CT: control target
= control target key end

     0   :  { %7 = vsyncpa [#allocation3], 0  ;;  %s432_s0 = inlined_call_operand.hbm [shape: f32[2,16,128], index: 0, kind: input, shape index: {}]   ;;  %s433_s1 = inlined_call_operand.hbm [shape: f32[2,1,2,128], index: 1, kind: input, shape index: {}]   ;;  %s434_s2 = inlined_call_operand.hbm [shape: f32[2,2,16,128], index: 2, kind: output, shape index: {}]  }
   0x1   :  { %8 = vsyncpa [#allocation6], 0 }
   0x2   :  { %9 = vsyncpa [#allocation4], 0  ;;  %s14_s11 = sshll.u32 %s432_s0, 4  ;;  %s345_s12 = smov [#allocation2]   ;;  %s15_s11 = int_to_ptr.hbm [resolvable:$true] %s14_s11 }
   0x3   :  { %s16_s13 = sshll.u32 %s345_s12, 4  ;;  %s27_s16 = sshll.u32 %s433_s1, 4  ;;  %s17_s13 = int_to_ptr.vmem [resolvable:$true] %s16_s13  ;;  %s28_s16 = int_to_ptr.hbm [resolvable:$true] %s27_s16 }
   0x4   :  { %s346_s17 = smov 128   ;;  %s347_s18 = smov 8  }
   0x5   :  { %22 = dma.hbm_to_vmem [thread:$0]  %s15_s11, 512, %s17_s13, [#allocation3], %s346_s17, %s346_s17, %s347_s18  }
   0x6   :  { %s348_s19 = smov [#allocation5]   ;;  %s349_s21 = smov 32  }
   0x7   :  { %s29_s20 = sshll.u32 %s348_s19, 4  ;;  %s350_s0 = smov 2   ;;  %s30_s20 = int_to_ptr.vmem [resolvable:$true] %s29_s20 }
   0x8   :  { %35 = dma.hbm_to_vmem [thread:$0]  %s28_s16, 64, %s30_s20, [#allocation6], %s349_s21, %s349_s21, %s350_s0  }
   0x9   :  { %339 = dma.done.wait [#allocation3], 512  }
   0xa   :  { %340 = vsyncadd [#allocation3], 4294966784 }
   0xb   :  { %341 = dma.done.wait [#allocation6], 64  }
   0xc   :  { %342 = vsyncadd [#allocation6], 4294967232  ;;  %v45_v0 = vld [vmem:[#allocation2 + $0x8] sm:$0xff]  ;;  %v48_v1 = vld [vmem:[#allocation5] sm:$0x3]  ;;  %vm54_vm0 = vcmask 1040384  }
   0xd   :  { %v44_v2 = vld [vmem:[#allocation2] sm:$0xff]  ;;  %v56_v3 = vrot.slane %v45_v0, 7  ;;  %v46_v5 = vld [vmem:[#allocation2 + $0x10] sm:$0xff]  ;;  %v47_v6 = vld [vmem:[#allocation2 + $0x18] sm:$0xff]  ;;  %s351_s1 = smov 1   ;;  %s352_s22 = smov 127  }
   0xe   :  { %v55_v4 = vrot.slane %v44_v2, 7  ;;  %v58_v7 = vrot.slane %v46_v5, 7  ;;  %v59_v8 = vrot.slane %v47_v6, 7  ;;  %v49_v12 = vld [vmem:[#allocation5 + $0x2] sm:$0x3]  ;;  %vm93_vm1 = vcmask 7168  }
   0xf   :  { %v69_v9 = vsel %vm54_vm0, %v56_v3, %v48_v1  ;;  %vm118_vm2 = vcmask 1039360   ;;  %vm161_vm3 = vcmask 1046528   ;;  %vm186_vm4 = vcmask 1045504   ;;  %s353_s23 = smov [#allocation7]   ;;  %s244_s27 = sshll.u32 %s434_s2, 4  ;;  %s245_s27 = int_to_ptr.hbm [resolvable:$true] %s244_s27 }
  0x10   :  { %v67_v10 = vsel %vm54_vm0, %v48_v1, %v55_v4  ;;  %79 = vrot.lane.b32.xlu1 %v69_v9, %s351_s1  ;;  %v381_v11 = vsel %vm54_vm0, %v58_v7, %v59_v8  ;;  %v385_v13 = vsel %vm54_vm0, %v49_v12, %v58_v7  ;;  %v57_v14 = vsel %vm54_vm0, %v55_v4, %v56_v3  ;;  %s242_s24 = sshll.u32 %s353_s23, 4  ;;  %s243_s24 = int_to_ptr.vmem [resolvable:$true] %s242_s24 }
  0x11   :  { %75 = vrot.lane.b32.xlu0 %v67_v10, %s351_s1  ;;  %83 = vrot.lane.b32.xlu2 %v381_v11, %s351_s1  ;;  %v70_v15 = vsel %vm54_vm0, %v59_v8, %v49_v12  ;;  %v133_v21 = vmul.f32 2.0, %v69_v9  ;;  %v131_v30 = vmul.f32 2.0, %v67_v10  ;;  %v132_v31 = vmul.f32 2.0, %v57_v14 }
  0x12   :  { %v136_v26 = vmul.f32 2.0, %v70_v15  ;;  %v135_v35 = vmul.f32 2.0, %v381_v11  ;;  %v134_v40 = vmul.f32 2.0, %v385_v13 }
  0x18   :  { %81 = vrot.lane.b32.xlu1 %v385_v13, %s351_s1 }
  0x19   :  { %77 = vrot.lane.b32.xlu0 %v57_v14, %s351_s1  ;;  %85 = vrot.lane.b32.xlu2 %v70_v15, %s351_s1 }
  0x20   :  { %102 = vrot.lane.b32.xlu1 %v57_v14, %s352_s22 }
  0x21   :  { %100 = vrot.lane.b32.xlu0 %v67_v10, %s352_s22  ;;  %104 = vrot.lane.b32.xlu2 %v69_v9, %s352_s22 }
  0x28   :  { %108 = vrot.lane.b32.xlu1 %v381_v11, %s352_s22 }
  0x29   :  { %106 = vrot.lane.b32.xlu0 %v385_v13, %s352_s22  ;;  %110 = vrot.lane.b32.xlu2 %v70_v15, %s352_s22 }
  0x6b   :  { %v84_v16 = vpop.permute.xlu2 %83 }
  0x6c   :  { %v98_v37 = vsel %vm93_vm1, %v381_v11, %v84_v16 }
  0x6d   :  { %v141_v53 = vadd.f32 %v135_v35, %v98_v37 }
  0x73   :  { %v86_v17 = vpop.permute.xlu2 %85 }
  0x74   :  { %v99_v29 = vsel %vm93_vm1, %v70_v15, %v86_v17 }
  0x75   :  { %v142_v38 = vadd.f32 %v136_v26, %v99_v29 }
  0x7b   :  { %v105_v20 = vpop.permute.xlu2 %104 }
  0x7c   :  { %v121_v25 = vsel %vm118_vm2, %v105_v20, %v69_v9 }
  0x82   :  { %v80_v18 = vpop.permute.xlu1 %79 }
  0x83   :  { %v76_v19 = vpop.permute.xlu0 %75  ;;  %v96_v22 = vsel %vm93_vm1, %v69_v9, %v80_v18  ;;  %v111_v28 = vpop.permute.xlu2 %110 }
  0x84   :  { %v139_v27 = vadd.f32 %v133_v21, %v96_v22  ;;  %v127_v32 = vsub.f32 %v96_v22, %v121_v25  ;;  %v94_v33 = vsel %vm93_vm1, %v67_v10, %v76_v19  ;;  %v124_v36 = vsel %vm118_vm2, %v111_v28, %v70_v15 }
  0x85   :  { %v137_v41 = vadd.f32 %v131_v30, %v94_v33  ;;  %v402_v46 = vsub.f32 %v99_v29, %v124_v36  ;;  %v148_v55 = vadd.f32 %v142_v38, %v124_v36 }
  0x86   :  { %v145_v39 = vadd.f32 %v139_v27, %v121_v25  ;;  %v151_v45 = vmul.f32 2.0, %v127_v32  ;;  %v190_v61 = vrot.slane %v127_v32, 2 }
  0x87   :  { %v154_v62 = vmul.f32 2.0, %v402_v46  ;;  %v219_v27 = vrot.slane %v148_v55, 2  ;;  %v195_v38 = vrot.slane %v402_v46, 2 }
  0x88   :  { %v214_v54 = vrot.slane %v145_v39, 2  ;;  %v165_v1 = vrot.slane %v151_v45, 1 }
  0x8a   :  { %v82_v23 = vpop.permute.xlu1 %81 }
  0x8b   :  { %v78_v24 = vpop.permute.xlu0 %77  ;;  %v97_v56 = vsel %vm93_vm1, %v385_v13, %v82_v23 }
  0x8c   :  { %v95_v34 = vsel %vm93_vm1, %v57_v14, %v78_v24  ;;  %v140_v5 = vadd.f32 %v134_v40, %v97_v56 }
  0x8d   :  { %v138_v42 = vadd.f32 %v132_v31, %v95_v34  ;;  %v170_v31 = vrot.slane %v154_v62, 1 }
  0x92   :  { %v103_v43 = vpop.permute.xlu1 %102 }
  0x93   :  { %v101_v44 = vpop.permute.xlu0 %100  ;;  %v120_v47 = vsel %vm118_vm2, %v103_v43, %v57_v14 }
  0x94   :  { %v119_v48 = vsel %vm118_vm2, %v101_v44, %v67_v10  ;;  %v126_v49 = vsub.f32 %v95_v34, %v120_v47  ;;  %v144_v50 = vadd.f32 %v138_v42, %v120_v47 }
  0x95   :  { %v125_v51 = vsub.f32 %v94_v33, %v119_v48  ;;  %v143_v52 = vadd.f32 %v137_v41, %v119_v48 }
  0x96   :  { %v150_v57 = vmul.f32 2.0, %v126_v49  ;;  %v188_v58 = vrot.slane %v126_v49, 2  ;;  %v212_v59 = vrot.slane %v144_v50, 2 }
  0x97   :  { %v149_v60 = vmul.f32 2.0, %v125_v51  ;;  %v187_v63 = vrot.slane %v125_v51, 2  ;;  %v211_v0 = vrot.slane %v143_v52, 2 }
  0x98   :  { %v163_v2 = vrot.slane %v150_v57, 1  ;;  %v215_v3 = vsel %vm186_vm4, %v212_v59, %v214_v54  ;;  %v191_v6 = vsel %vm186_vm4, %v188_v58, %v190_v61 }
  0x99   :  { %v162_v4 = vrot.slane %v149_v60, 1  ;;  %v226_v7 = vsub.f32 %v144_v50, %v215_v3  ;;  %v213_v8 = vsel %vm186_vm4, %v211_v0, %v212_v59  ;;  %v189_v12 = vsel %vm186_vm4, %v187_v63, %v188_v58 }
  0x9a   :  { %v166_v9 = vsel %vm161_vm3, %v163_v2, %v165_v1  ;;  %v225_v14 = vsub.f32 %v143_v52, %v213_v8  ;;  %v109_v15 = vpop.permute.xlu1 %108 }
  0x9b   :  { %v164_v10 = vsel %vm161_vm3, %v162_v4, %v163_v2  ;;  %v107_v16 = vpop.permute.xlu0 %106  ;;  %v177_v17 = vadd.f32 %v166_v9, %v126_v49  ;;  %235 = vst [vmem:[#allocation7 + $0x18] sm:$0xff] %v226_v7  ;;  %v123_v19 = vsel %vm118_vm2, %v109_v15, %v381_v11 }
  0x9c   :  { %v176_v18 = vadd.f32 %v164_v10, %v125_v51  ;;  %v122_v20 = vsel %vm118_vm2, %v107_v16, %v385_v13  ;;  %234 = vst [vmem:[#allocation7 + $0x10] sm:$0xff] %v225_v14  ;;  %v129_v21 = vsub.f32 %v98_v37, %v123_v19  ;;  %v147_v22 = vadd.f32 %v141_v53, %v123_v19 }
  0x9d   :  { %v128_v23 = vsub.f32 %v97_v56, %v122_v20  ;;  %v146_v24 = vadd.f32 %v140_v5, %v122_v20  ;;  %v202_v25 = vadd.f32 %v191_v6, %v177_v17 }
  0x9e   :  { %v201_v26 = vadd.f32 %v189_v12, %v176_v18  ;;  %v153_v28 = vmul.f32 2.0, %v129_v21  ;;  %v217_v29 = vrot.slane %v147_v22, 2  ;;  %v193_v32 = vrot.slane %v129_v21, 2 }
  0x9f   :  { %v152_v30 = vmul.f32 2.0, %v128_v23  ;;  %230 = vst [vmem:[#allocation7 + $0x8] sm:$0xff] %v202_v25  ;;  %v216_v33 = vrot.slane %v146_v24, 2  ;;  %v192_v35 = vrot.slane %v128_v23, 2 }
  0xa0   :  { %229 = vst [vmem:[#allocation7] sm:$0xff] %v201_v26  ;;  %v168_v11 = vrot.slane %v153_v28, 1  ;;  %v220_v34 = vsel %vm186_vm4, %v217_v29, %v219_v27  ;;  %v196_v44 = vsel %vm186_vm4, %v193_v32, %v195_v38 }
  0xa1   :  { %v167_v13 = vrot.slane %v152_v30, 1  ;;  %v228_v36 = vsub.f32 %v147_v22, %v220_v34  ;;  %v218_v37 = vsel %vm186_vm4, %v216_v33, %v217_v29  ;;  %v194_v45 = vsel %vm186_vm4, %v192_v35, %v193_v32 }
  0xa2   :  { %v171_v39 = vsel %vm161_vm3, %v168_v11, %v170_v31  ;;  %v227_v41 = vsub.f32 %v146_v24, %v218_v37 }
  0xa3   :  { %v169_v40 = vsel %vm161_vm3, %v167_v13, %v168_v11  ;;  %v179_v42 = vadd.f32 %v171_v39, %v129_v21  ;;  %237 = vst [vmem:[#allocation7 + $0x38] sm:$0xff] %v228_v36 }
  0xa4   :  { %v178_v43 = vadd.f32 %v169_v40, %v128_v23  ;;  %236 = vst [vmem:[#allocation7 + $0x30] sm:$0xff] %v227_v41 }
  0xa5   :  { %v204_v46 = vadd.f32 %v196_v44, %v179_v42 }
  0xa6   :  { %v203_v47 = vadd.f32 %v194_v45, %v178_v43 }
  0xa7   :  { %232 = vst [vmem:[#allocation7 + $0x28] sm:$0xff] %v204_v46 }
  0xa8   :  { %231 = vst [vmem:[#allocation7 + $0x20] sm:$0xff] %v203_v47 }
  0xa9   :  { %250 = dma.vmem_to_hbm [thread:$0]  %s243_s24, 1024, %s245_s27, [#allocation4], %s346_s17, %s346_s17, %s347_s18  }
  0xaa   :  { %343 = dma.done.wait [#allocation4], 1024  }
  0xab   :  { %344 = vsyncadd [#allocation4], 4294966272 }
  0xac   :  { %255 = vsyncpa [#allocation3], 1 }
  0xad   :  { %256 = vsyncpa [#allocation6], 1 }
  0xae   :  { %257 = vsyncpa [#allocation4], 1 }

</bundles_post_ra>
